<compile_context>
chip_gen: v7x
topology: tpu7x:2x2x1
jax: 0.10.0
libtpu: 0.0.40
codegen_flags: <defaults>
</compile_context>

<pallas_src>
import jax
import jax.numpy as jnp
from jax.experimental import pallas as pl
from jax.experimental.pallas import tpu as pltpu


def _round_up(x, m):
    return ((x + m - 1) // m) * m


def _make_linear_block_kernel(accumulate_in_out: bool, mxu_bf16: bool, slope: float):
    """Builds the per-tile kernel. K (contraction) is the innermost grid axis."""

    def kernel(x_ref, w_ref, b_ref, o_ref, *scratch):
        acc_ref = o_ref if accumulate_in_out else scratch[0]
        k = pl.program_id(2)

        @pl.when(k == 0)
        def _zero():
            acc_ref[...] = jnp.zeros_like(acc_ref)

        x = x_ref[...]
        w = w_ref[...]
        if mxu_bf16:
            x = x.astype(jnp.bfloat16)
            w = w.astype(jnp.bfloat16)
        acc_ref[...] += jnp.dot(x, w, preferred_element_type=jnp.float32)

        @pl.when(k == pl.num_programs(2) - 1)
        def _epilogue():
            y = acc_ref[...] + b_ref[...].astype(jnp.float32)
            o_ref[...] = jnp.maximum(y, slope * y).astype(o_ref.dtype)

    return kernel


def linear_block(x, weight, bias, *, tm=512, tn=512, tk=1024,
                 mxu_bf16=False, input_buffer_count=2, vmem_limit_bytes=None):
    """LinearBlock forward: LeakyReLU_{0.2}(x @ weight.T + bias).

    x:      (..., in_features)
    weight: (out_features, in_features)   # PyTorch nn.Linear layout
    bias:   (out_features,)
    """
    orig_shape = x.shape
    in_f = orig_shape[-1]
    out_f, in_f_w = weight.shape
    assert in_f == in_f_w, "weight/in_features mismatch"
    x2 = x.reshape(-1, in_f)
    B = x2.shape[0]
    out_dtype = x.dtype

    # ---- tile selection -----------------------------------------------------
    # A block dim must be a multiple of (8, 128) OR equal to the full dim, and
    # we never let a block exceed the array (shrink to the exact dim instead).
    tm = B if B <= tm else _round_up(tm, 8)
    tn = out_f if out_f <= tn else _round_up(tn, 128)
    if in_f <= tk:
        tk = in_f
        K = in_f                     # single K step, no padding needed
    else:
        tk = _round_up(tk, 128)
        K = _round_up(in_f, tk)      # K must be zero-padded (OOB K corrupts sums)

    # Keep >=2 blocks along a "parallel" axis when possible so v7x's 2 TCs
    # both get work (no-op on v5e/v6e which have a single TensorCore).
    if pl.cdiv(B, tm) == 1 and pl.cdiv(out_f, tn) == 1:
        if tn > 128:
            tn = _round_up(max(tn // 2, 128), 128)
        elif tm > 8:
            tm = _round_up(max(tm // 2, 8), 8)

    grid_m = pl.cdiv(B, tm)
    grid_n = pl.cdiv(out_f, tn)
    grid_k = K // tk
    grid = (grid_m, grid_n, grid_k)

    # ---- operands: pre-transpose W once; zero-pad only K ---------------------
    # TODO(synk): in a full model, store the weight pre-transposed as a
    # parameter so this one-time transpose leaves the hot path entirely.
    w_t = jnp.transpose(weight)                       # (in_f, out_f)
    if K != in_f:
        x2 = jnp.pad(x2, ((0, 0), (0, K - in_f)))
        w_t = jnp.pad(w_t, ((0, K - in_f), (0, 0)))
    b2 = bias.reshape(1, out_f)

    accumulate_in_out = (jnp.dtype(out_dtype) == jnp.float32)
    scratch_shapes = [] if accumulate_in_out else [pltpu.VMEM((tm, tn), jnp.float32)]

    # ---- VMEM budget: sized to the tiles, capped near half of v7x's 64 MiB --
    isz = x2.dtype.itemsize
    osz = jnp.dtype(out_dtype).itemsize
    est = (input_buffer_count * (tm * tk + tk * tn) * isz     # pipelined inputs
           + 2 * tm * tn * osz                                # output block
           + 2 * tn * bias.dtype.itemsize)                    # bias block
    if not accumulate_in_out:
        est += tm * tn * 4
    if vmem_limit_bytes is None:
        vmem_limit_bytes = max(2 * est, 16 * 1024 * 1024)
        vmem_limit_bytes = min(vmem_limit_bytes,
                               max(28 * 1024 * 1024, est + 2 * 1024 * 1024))

    extra = {}
    if input_buffer_count != 2:
        extra["pipeline_mode"] = pl.Buffered(input_buffer_count)

    kernel = _make_linear_block_kernel(accumulate_in_out, mxu_bf16, 0.2)

    out = pl.pallas_call(
        kernel,
        out_shape=jax.ShapeDtypeStruct((B, out_f), out_dtype),
        grid_spec=pltpu.PrefetchScalarGridSpec(
            num_scalar_prefetch=0,
            grid=grid,
            in_specs=[
                pl.BlockSpec((tm, tk), lambda i, j, k: (i, k), **extra),   # x
                pl.BlockSpec((tk, tn), lambda i, j, k: (k, j), **extra),   # W^T
                pl.BlockSpec((1, tn), lambda i, j, k: (0, j)),             # bias
            ],
            out_specs=pl.BlockSpec((tm, tn), lambda i, j, k: (i, j)),
            scratch_shapes=scratch_shapes,
        ),
        compiler_params=pltpu.CompilerParams(
            dimension_semantics=("parallel", "parallel", "arbitrary"),
            vmem_limit_bytes=int(vmem_limit_bytes),
        ),
        cost_estimate=pl.CostEstimate(
            flops=2 * B * in_f * out_f,
            transcendentals=0,
            bytes_accessed=int(grid_n * B * in_f * isz
                               + grid_m * in_f * out_f * weight.dtype.itemsize
                               + grid_m * out_f * bias.dtype.itemsize
                               + B * out_f * osz),
        ),
    )(x2, w_t, b2)

    return out.reshape(*orig_shape[:-1], out_f)


def _reference(x, weight, bias):
    y = x @ weight.T + bias
    return jnp.maximum(y, 0.2 * y)


if __name__ == "__main__":
    key = jax.random.PRNGKey(0)
    k_x, k_w, k_b, k_x2, k_w2, k_b2 = jax.random.split(key, 6)

    # --- Case 1: small shapes matching the module (single-block grid,
    # full-dim blocks, accumulate directly into the f32 output block). ---
    B, in_features, out_features = 8, 32, 64
    bound = 1.0 / (in_features ** 0.5)
    x = jax.random.normal(k_x, (B, in_features), dtype=jnp.float32)
    weight = jax.random.uniform(k_w, (out_features, in_features),
                                minval=-bound, maxval=bound, dtype=jnp.float32)
    bias = jax.random.uniform(k_b, (out_features,),
                              minval=-bound, maxval=bound, dtype=jnp.float32)

    out = linear_block(x, weight, bias)
    jax.block_until_ready(out)
    assert out.shape == (B, out_features)
    assert jnp.allclose(out, _reference(x, weight, bias), atol=1e-5, rtol=1e-5), \
        "case 1 mismatch vs reference"

    # --- Case 2: non-aligned shapes, small tiles -> grid (2, 2, 3):
    # K accumulation + K zero-pad + partial boundary M/N blocks (OOB writes
    # dropped), no M/N padding copies and no output slice. ---
    B2, in2, out2 = 16, 320, 192
    bound2 = 1.0 / (in2 ** 0.5)
    x2 = jax.random.normal(k_x2, (B2, in2), dtype=jnp.float32)
    w2 = jax.random.uniform(k_w2, (out2, in2), minval=-bound2, maxval=bound2,
                            dtype=jnp.float32)
    b2 = jax.random.uniform(k_b2, (out2,), minval=-bound2, maxval=bound2,
                            dtype=jnp.float32)

    out2_v = linear_block(x2, w2, b2, tm=8, tn=128, tk=128)
    jax.block_until_ready(out2_v)
    assert out2_v.shape == (B2, out2)
    assert jnp.allclose(out2_v, _reference(x2, w2, b2), atol=2e-4, rtol=2e-4), \
        "case 2 mismatch vs reference"

    # --- Case 3: bf16 MXU-feed knob (f32 accumulation + f32 epilogue kept);
    # also exercises the N-split heuristic for v7x parallelism. ---
    out3 = linear_block(x2, w2, b2, mxu_bf16=True)
    jax.block_until_ready(out3)
    assert out3.shape == (B2, out2)
    assert jnp.allclose(out3, _reference(x2, w2, b2), atol=2e-2, rtol=2e-2), \
        "case 3 (bf16 MXU feed) mismatch vs reference"

    print("KERNEL_OK")
</pallas_src>

<mosaic_0001>
module attributes {stable_mosaic.version = 11 : i64} {
  func.func @kernel(%arg0: i32, %arg1: i32, %arg2: i32, %arg3: memref<8x32xf32, #tpu.memory_space<vmem>>, %arg4: memref<32x64xf32, #tpu.memory_space<vmem>>, %arg5: memref<1x64xf32, #tpu.memory_space<vmem>>, %arg6: memref<8x64xf32, #tpu.memory_space<vmem>>) attributes {dimension_semantics = [#tpu.dimension_semantics<parallel>, #tpu.dimension_semantics<parallel>, #tpu.dimension_semantics<arbitrary>], iteration_bounds = array<i64: 1, 1, 1>, scalar_prefetch = 0 : i64, scratch_operands = 0 : i64, tpu.core_type = #tpu.core_type<tc>, window_params = [{transform_indices = @transform_0, window_bounds = array<i64: 8, 32>}, {transform_indices = @transform_1, window_bounds = array<i64: 32, 64>}, {transform_indices = @transform_2, window_bounds = array<i64: 1, 64>}, {transform_indices = @transform_3, window_bounds = array<i64: 8, 64>}]} {
    %c0_i32 = arith.constant 0 : i32
    %0 = arith.cmpi eq, %arg2, %c0_i32 : i32
    %1 = arith.extui %0 : i1 to i32
    %c0_i32_0 = arith.constant 0 : i32
    %2 = arith.cmpi ne, %1, %c0_i32_0 : i32
    scf.if %2 {
      %cst_10 = arith.constant 0.000000e+00 : f32
      %12 = vector.broadcast %cst_10 : f32 to vector<8x64xf32>
      %c0_11 = arith.constant 0 : index
      %c0_12 = arith.constant 0 : index
      %13 = vector.load %arg6[%c0_11, %c0_12] : memref<8x64xf32, #tpu.memory_space<vmem>>, vector<8x64xf32>
      tpu.vector_store %arg6[%c0_11, %c0_12], %12 {strides = array<i32>} : memref<8x64xf32, #tpu.memory_space<vmem>>, vector<8x64xf32>,
    } else {
    }
    %c0 = arith.constant 0 : index
    %c0_1 = arith.constant 0 : index
    %3 = vector.load %arg3[%c0, %c0_1] : memref<8x32xf32, #tpu.memory_space<vmem>>, vector<8x32xf32>
    %c0_2 = arith.constant 0 : index
    %c0_3 = arith.constant 0 : index
    %4 = vector.load %arg4[%c0_2, %c0_3] : memref<32x64xf32, #tpu.memory_space<vmem>>, vector<32x64xf32>
    %c0_4 = arith.constant 0 : index
    %c0_5 = arith.constant 0 : index
    %5 = vector.load %arg6[%c0_4, %c0_5] : memref<8x64xf32, #tpu.memory_space<vmem>>, vector<8x64xf32>
    %cst = arith.constant dense<0.000000e+00> : vector<8x64xf32>
    %6 = tpu.matmul %3, %4, %cst {dimension_numbers = #tpu.dot_dimension_numbers<[1], [0], [0], [1], [0, 0, 1, 1], [], []>} : vector<8x32xf32>, vector<32x64xf32>, vector<8x64xf32> -> vector<8x64xf32>
    %7 = arith.addf %5, %6 : vector<8x64xf32>
    %c0_6 = arith.constant 0 : index
    %c0_7 = arith.constant 0 : index
    %8 = vector.load %arg6[%c0_6, %c0_7] : memref<8x64xf32, #tpu.memory_space<vmem>>, vector<8x64xf32>
    tpu.vector_store %arg6[%c0_6, %c0_7], %7 {strides = array<i32>} : memref<8x64xf32, #tpu.memory_space<vmem>>, vector<8x64xf32>,
    %c0_i32_8 = arith.constant 0 : i32
    %9 = arith.cmpi eq, %arg2, %c0_i32_8 : i32
    %10 = arith.extui %9 : i1 to i32
    %c0_i32_9 = arith.constant 0 : i32
    %11 = arith.cmpi ne, %10, %c0_i32_9 : i32
    scf.if %11 {
      %c0_10 = arith.constant 0 : index
      %c0_11 = arith.constant 0 : index
      %12 = vector.load %arg6[%c0_10, %c0_11] : memref<8x64xf32, #tpu.memory_space<vmem>>, vector<8x64xf32>
      %c0_12 = arith.constant 0 : index
      %c0_13 = arith.constant 0 : index
      %13 = vector.load %arg5[%c0_12, %c0_13] : memref<1x64xf32, #tpu.memory_space<vmem>>, vector<1x64xf32>
      %14 = vector.broadcast %13 : vector<1x64xf32> to vector<8x64xf32>
      %15 = arith.addf %12, %14 : vector<8x64xf32>
      %cst_14 = arith.constant 2.000000e-01 : f32
      %16 = vector.broadcast %cst_14 : f32 to vector<8x64xf32>
      %17 = arith.mulf %16, %15 : vector<8x64xf32>
      %18 = arith.maximumf %15, %17 : vector<8x64xf32>
      %c0_15 = arith.constant 0 : index
      %c0_16 = arith.constant 0 : index
      %19 = vector.load %arg6[%c0_15, %c0_16] : memref<8x64xf32, #tpu.memory_space<vmem>>, vector<8x64xf32>
      tpu.vector_store %arg6[%c0_15, %c0_16], %18 {strides = array<i32>} : memref<8x64xf32, #tpu.memory_space<vmem>>, vector<8x64xf32>,
    } else {
    }
    return
  }
  func.func @transform_0(%arg0: i32, %arg1: i32, %arg2: i32) -> (i32, i32) {
    %c0_i32 = arith.constant 0 : i32
    return %arg0, %arg2 : i32, i32
  }
  func.func @transform_1(%arg0: i32, %arg1: i32, %arg2: i32) -> (i32, i32) {
    %c0_i32 = arith.constant 0 : i32
    return %arg2, %arg1 : i32, i32
  }
  func.func @transform_2(%arg0: i32, %arg1: i32, %arg2: i32) -> (i32, i32) {
    %c0_i32 = arith.constant 0 : i32
    %c0_i32_0 = arith.constant 0 : i32
    return %c0_i32, %arg1 : i32, i32
  }
  func.func @transform_3(%arg0: i32, %arg1: i32, %arg2: i32) -> (i32, i32) {
    %c0_i32 = arith.constant 0 : i32
    return %arg0, %arg1 : i32, i32
  }
}

</mosaic_0001>

<bundles_post_ra>
// kernel: tpu_custom_call.1
= control target key start
LH: loop header
LB: loop body
LE: loop exit
PB: predicated region body
PF: predicated region fallthrough
CT: control target
= control target key end

     0   :  { %8 = vsyncpa [#allocation3], 0  ;;  %s342_s0 = inlined_call_operand.hbm [shape: f32[8,32], index: 0, kind: input, shape index: {}]   ;;  %s343_s1 = inlined_call_operand.hbm [shape: f32[32,64], index: 1, kind: input, shape index: {}]   ;;  %s344_s2 = inlined_call_operand.vmem [shape: f32[1,64], index: 2, kind: input, shape index: {}]   ;;  %s345_s3 = inlined_call_operand.hbm [shape: f32[8,64], index: 3, kind: output, shape index: {}]  }
   0x1   :  { %9 = vsyncpa [#allocation6], 0 }
   0x2   :  { %10 = vsyncpa [#allocation4], 0  ;;  %s265_s12 = smov [#allocation2]   ;;  %s266_s14 = smov [#allocation5]  }
   0x3   :  { %s17_s13 = sshll.u32 %s265_s12, 4  ;;  %s26_s15 = sshll.u32 %s266_s14, 4  ;;  %s18_s13 = int_to_ptr.vmem [resolvable:$true] %s17_s13  ;;  %s293_s15 = int_to_ptr.vmem [resolvable:$true] %s26_s15 }
   0x4   :  { %s193_s18 = scalar_lea.hbm %s342_s0, 128 }
   0x5   :  { %p194_p0 = scmp.ne.s32.totalorder %s342_s0, %s193_s18  ;;  %p197_p1 = scmp.lt.u32.totalorder %s193_s18, %s342_s0 }
   0x7   :  { %p199_p2 = pnand %p197_p1, %p194_p0 }
   0x9   :  { %202 = shalt.err (!%p199_p2)
}
   0xa   :  { %s203_s23 = scalar_lea.vmem %s18_s13, 128  ;;  %p208_p4 = scmp.lt.s32.totalorder %s18_s13, %s18_s13 }
   0xb   :  { %p204_p3 = scmp.ne.s32.totalorder %s18_s13, %s203_s23  ;;  %p209_p5 = scmp.lt.s32.totalorder %s203_s23, %s203_s23 }
   0xd   :  { %p210_p6 = por %p209_p5, %p208_p4 }
   0xf   :  { %p211_p7 = pnand %p210_p6, %p204_p3 }
  0x11   :  { %214 = shalt.err (!%p211_p7)
}
  0x12   :  { %20 = dma.hbm_to_vmem [thread:$0]  %s342_s0, 128, %s18_s13, [#allocation3]  }
  0x13   :  { %s215_s28 = scalar_lea.hbm %s343_s1, 512 }
  0x14   :  { %p216_p8 = scmp.ne.s32.totalorder %s343_s1, %s215_s28  ;;  %p219_p9 = scmp.lt.u32.totalorder %s215_s28, %s343_s1 }
  0x16   :  { %p221_p10 = pnand %p219_p9, %p216_p8 }
  0x18   :  { %224 = shalt.err (!%p221_p10)
}
  0x19   :  { %s225_s6 = scalar_lea.vmem %s293_s15, 512  ;;  %p230_p12 = scmp.lt.s32.totalorder %s293_s15, %s293_s15 }
  0x1a   :  { %p226_p11 = scmp.ne.s32.totalorder %s293_s15, %s225_s6  ;;  %p231_p13 = scmp.lt.s32.totalorder %s225_s6, %s225_s6 }
  0x1c   :  { %p232_p0 = por %p231_p13, %p230_p12 }
  0x1e   :  { %p233_p1 = pnand %p232_p0, %p226_p11 }
  0x20   :  { %236 = shalt.err (!%p233_p1)
}
  0x21   :  { %s267_s0 = smov 128   ;;  %s268_s7 = smov 8  }
  0x22   :  { %32 = dma.hbm_to_vmem [thread:$0]  %s343_s1, 512, %s293_s15, [#allocation6], %s267_s0, %s267_s0, %s268_s7  }
  0x23   :  { %259 = dma.done.wait [#allocation3], 128  }
  0x24   :  { %260 = vsyncadd [#allocation3], 4294967168 }
  0x25   :  { %261 = dma.done.wait [#allocation6], 512  }
  0x26   :  { %262 = vsyncadd [#allocation6], 4294966784  ;;  %vm45_vm0 = vcmask 523264   ;;  %v269_v0 = vmov 0.0|0.0   ;;  %v270_v1 = vmov 0.0   ;;  %vm271_vm1 = vmmov 0  }
  0x27   :  { %179 = vmatprep.subr.bf16.mxu0 %v269_v0  ;;  %46 = vst.msk [vmem:[#allocation7] sm:$0xff] %vm45_vm0, %v270_v1  ;;  %176 = vmatprep.mubr.msk.f32.mxu0 %vm271_vm1, %v270_v1  ;;  %v48_v2 = vld [vmem:[#allocation5] sm:$0xff]  ;;  %v49_v3 = vld [vmem:[#allocation5 + $0x8] sm:$0xff]  ;;  %v50_v4 = vld [vmem:[#allocation5 + $0x10] sm:$0xff]  ;;  %vm53_vm2 = vcmask 261120   ;;  %s272_s11 = smov [#allocation7]  }
  0x28   :  { %v180_v5 = vpack.c.bf16 %v49_v3, %v48_v2  ;;  %v51_v6 = vld [vmem:[#allocation5 + $0x18] sm:$0xff]  ;;  %s151_s12 = sshll.u32 %s272_s11, 4  ;;  %s152_s12 = int_to_ptr.vmem [resolvable:$true] %s151_s12 }
  0x29   :  { %v183_v7 = vpack.c.bf16 %v51_v6, %v50_v4  ;;  %v47_v8 = vld [vmem:[#allocation2] sm:$0xff]  ;;  %s237_s13 = scalar_lea.vmem %s152_s12, 128  ;;  %p242_p3 = scmp.lt.s32.totalorder %s152_s12, %s152_s12 }
  0x2a   :  { %181 = vmatpush3.bf16.msra.mxu0 %v180_v5  ;;  %v162_v13 = vld [vmem:[%s344_s2] ss:$0 sm:$0xff]  ;;  %p238_p2 = scmp.ne.s32.totalorder %s152_s12, %s237_s13  ;;  %p243_p4 = scmp.lt.s32.totalorder %s237_s13, %s237_s13 }
  0x2b   :  { %182 = vmatprep.subr.bf16.mxu0 %v269_v0 }
  0x2c   :  { %p244_p5 = por %p243_p4, %p242_p3 }
  0x2e   :  { %184 = vmatpush3.bf16.msra.mxu0 %v183_v7  ;;  %v52_v9 = vld [vmem:[#allocation7] sm:$0xff]  ;;  %p245_p6 = pnand %p244_p5, %p238_p2 }
  0x31   :  { %177 = vmatmul.mubr.msk.f32.vlgmr.msra.gmra.mrb[0].mxu0 %vm53_vm2, %v47_v8 }
 0x104   :  { %v123_v10 = vpop.f32.mrb[0].mxu0 }
 0x105   :  { %v127_v11 = vadd.f32 %v123_v10, %v52_v9  ;;  %v178_v12 = vpop.f32.mrb[1].mxu0 }
 0x107   :  { %129 = vst.msk [vmem:[#allocation7] sm:$0xff] %vm45_vm0, %v127_v11 }
 0x10e   :  { %v133_v14 = vld [vmem:[#allocation7] sm:$0xff] }
 0x10f   :  { %v141_v15 = vadd.f32 %v162_v13, %v133_v14 }
 0x111   :  { %v142_v16 = vmul.f32 0.2, %v141_v15 }
 0x113   :  { %v143_v17 = vmax.f32 %v141_v15, %v142_v16 }
 0x115   :  { %144 = vst.msk [vmem:[#allocation7] sm:$0xff] %vm45_vm0, %v143_v17 }
 0x116   :  { %248 = shalt.err (!%p245_p6)
}
 0x117   :  { %s249_s2 = scalar_lea.hbm %s345_s3, 128 }
 0x118   :  { %p250_p7 = scmp.ne.s32.totalorder %s345_s3, %s249_s2  ;;  %p253_p8 = scmp.lt.u32.totalorder %s249_s2, %s345_s3 }
 0x11a   :  { %p255_p9 = pnand %p253_p8, %p250_p7 }
 0x11c   :  { %258 = shalt.err (!%p255_p9)
}
 0x11d   :  { %154 = dma.vmem_to_hbm [thread:$0]  %s152_s12, 128, %s345_s3, [#allocation4]  }
 0x11e   :  { %263 = dma.done.wait [#allocation4], 128  }
 0x11f   :  { %264 = vsyncadd [#allocation4], 4294967168 }
 0x120   :  { %158 = vsyncpa [#allocation3], 1 }
 0x121   :  { %159 = vsyncpa [#allocation6], 1 }
 0x122   :  { %160 = vsyncpa [#allocation4], 1 }

</bundles_post_ra>
